<compile_context>
chip_gen: v5e
topology: v5e:2x2
jax: 0.10.0
libtpu: 0.0.40
codegen_flags: <defaults>
</compile_context>

<pallas_src>
import math

import jax
import jax.numpy as jnp
from jax.experimental import pallas as pl
from jax.experimental.pallas import tpu as pltpu


# ----------------------------- kernels ------------------------------------- #

def _make_layernorm_kernel(eps: float):
    def kernel(x_ref, g_ref, b_ref, o_ref):
        # x_ref: (TR, D); g_ref/b_ref: (1, D)
        x = x_ref[...].astype(jnp.float32)
        d = x.shape[-1]

        mean = jnp.mean(x, axis=-1, keepdims=True)
        diff = x - mean
        # PyTorch x.std(dim=-1) is the *unbiased* std (divides by N-1).
        var = jnp.sum(diff * diff, axis=-1, keepdims=True) * (1.0 / (d - 1))
        std = jnp.sqrt(var)

        inv = pl.reciprocal(std + jnp.float32(eps), approx=False)
        y = g_ref[...].astype(jnp.float32) * (diff * inv) + b_ref[...].astype(jnp.float32)
        o_ref[...] = y.astype(o_ref.dtype)

    return kernel


def _residual_add_kernel(x_ref, y_ref, o_ref):
    # TODO(synk): dropout is treated as eval-mode identity (PyTorch's RNG stream
    # cannot be reproduced inside the kernel); training-mode masking would use
    # pltpu.prng_seed + pltpu.prng_random_bits here.
    o_ref[...] = x_ref[...] + y_ref[...]


# ----------------------------- wrappers ------------------------------------ #

def _pick_block_rows(n: int) -> int:
    """Largest row-tile that is a multiple of 8 and divides n (else full n)."""
    for cand in (1024, 512, 256, 128, 64, 32, 16, 8):
        if n % cand == 0:
            return cand
    return n  # full extent is always a legal block shape


def _row_tiled_call(kernel, out_dtype, n, d, extra_inputs, x2, *more_arrays):
    tr = _pick_block_rows(n)
    grid = (n // tr,)
    row_spec = pl.BlockSpec((tr, d), lambda i: (i, 0))
    bcast_spec = pl.BlockSpec((1, d), lambda i: (0, 0))

    in_specs = [row_spec] + [bcast_spec] * extra_inputs + [row_spec] * len(more_arrays[extra_inputs:])
    # (extra_inputs broadcast arrays come first in `more_arrays`)

    return pl.pallas_call(
        kernel,
        out_shape=jax.ShapeDtypeStruct((n, d), out_dtype),
        grid_spec=pltpu.PrefetchScalarGridSpec(
            num_scalar_prefetch=0,
            grid=grid,
            in_specs=in_specs,
            out_specs=row_spec,
        ),
        compiler_params=pltpu.CompilerParams(
            dimension_semantics=("parallel",)),
    )(x2, *more_arrays)


def layer_norm(x, gamma, beta, eps: float = 1e-6):
    """PyTorch-style LayerNormalization over the last dim of x."""
    orig_shape = x.shape
    d = orig_shape[-1]
    x2 = x.reshape(-1, d)
    n = x2.shape[0]
    out = _row_tiled_call(
        _make_layernorm_kernel(eps), x.dtype, n, d,
        2,  # gamma, beta are (1, D) broadcast inputs
        x2, gamma.reshape(1, d), beta.reshape(1, d))
    return out.reshape(orig_shape)


def residual_add(x, y):
    """x + y (dropout treated as eval-mode identity)."""
    orig_shape = x.shape
    d = orig_shape[-1]
    x2 = x.reshape(-1, d)
    y2 = y.reshape(-1, d)
    n = x2.shape[0]
    out = _row_tiled_call(
        _residual_add_kernel, x.dtype, n, d,
        0,
        x2, y2)
    return out.reshape(orig_shape)


def residual_connection(x, sublayer, gamma, beta, eps: float = 1e-6):
    """ResidualConnection.forward: x + dropout(sublayer(norm(x))), eval mode."""
    y = layer_norm(x, gamma, beta, eps)
    y = sublayer(y)          # arbitrary callable: runs as plain JAX between kernels
    return residual_add(x, y)


# ----------------------------- reference ----------------------------------- #

def reference_residual_connection(x, sublayer, gamma, beta, eps: float = 1e-6):
    mean = jnp.mean(x, axis=-1, keepdims=True)
    diff = x - mean
    var = jnp.sum(diff * diff, axis=-1, keepdims=True) / (x.shape[-1] - 1)
    std = jnp.sqrt(var)
    y = gamma * diff / (std + eps) + beta
    y = sublayer(y)
    return x + y


# ----------------------------- demo / test --------------------------------- #

if __name__ == "__main__":
    B, S, D = 2, 8, 32
    eps = 1e-6

    key = jax.random.PRNGKey(0)
    kx, kg, kb, kw = jax.random.split(key, 4)

    x = jax.random.normal(kx, (B, S, D), dtype=jnp.float32)

    # LayerNormalization parameters (PyTorch init: gamma=1, beta=0); perturb a bit
    # so the test actually exercises the affine part.
    gamma = jnp.ones((D,), jnp.float32) + 0.1 * jax.random.normal(kg, (D,), jnp.float32)
    beta = 0.1 * jax.random.normal(kb, (D,), jnp.float32)

    # Example sublayer: a small deterministic feed-forward (plain JAX callable).
    bound = 1.0 / math.sqrt(D)
    w_ff = jax.random.uniform(kw, (D, D), jnp.float32, -bound, bound)
    sublayer = lambda t: jnp.tanh(t @ w_ff)

    out = residual_connection(x, sublayer, gamma, beta, eps)
    out = jax.block_until_ready(out)

    ref = reference_residual_connection(x, sublayer, gamma, beta, eps)
    assert out.shape == (B, S, D)
    assert jnp.allclose(out, ref, atol=1e-4, rtol=1e-4), "mismatch vs reference"

    print("KERNEL_OK")
</pallas_src>

<mosaic_0001>
module attributes {stable_mosaic.version = 11 : i64} {
  func.func @kernel(%arg0: i32, %arg1: memref<16x32xf32, #tpu.memory_space<vmem>>, %arg2: memref<1x32xf32, #tpu.memory_space<vmem>>, %arg3: memref<1x32xf32, #tpu.memory_space<vmem>>, %arg4: memref<16x32xf32, #tpu.memory_space<vmem>>) attributes {dimension_semantics = [#tpu.dimension_semantics<parallel>], iteration_bounds = array<i64: 1>, scalar_prefetch = 0 : i64, scratch_operands = 0 : i64, tpu.core_type = #tpu.core_type<tc>, window_params = [{transform_indices = @transform_0, window_bounds = array<i64: 16, 32>}, {pipeline_mode = #tpu.pipeline_mode<synchronous>, transform_indices = @transform_1, window_bounds = array<i64: 1, 32>}, {pipeline_mode = #tpu.pipeline_mode<synchronous>, transform_indices = @transform_2, window_bounds = array<i64: 1, 32>}, {transform_indices = @transform_3, window_bounds = array<i64: 16, 32>}]} {
    %c0 = arith.constant 0 : index
    %c0_0 = arith.constant 0 : index
    %0 = vector.load %arg1[%c0, %c0_0] : memref<16x32xf32, #tpu.memory_space<vmem>>, vector<16x32xf32>
    %cst = arith.constant dense<0.000000e+00> : vector<16xf32>
    %1 = vector.multi_reduction <add>, %0, %cst [1] : vector<16x32xf32> to vector<16xf32>
    %2 = vector.shape_cast %1 : vector<16xf32> to vector<16x1xf32>
    %cst_1 = arith.constant 3.200000e+01 : f32
    %3 = vector.broadcast %cst_1 : f32 to vector<16x1xf32>
    %4 = arith.divf %2, %3 : vector<16x1xf32>
    %5 = vector.broadcast %4 : vector<16x1xf32> to vector<16x32xf32>
    %6 = arith.subf %0, %5 : vector<16x32xf32>
    %7 = arith.mulf %6, %6 : vector<16x32xf32>
    %cst_2 = arith.constant dense<0.000000e+00> : vector<16xf32>
    %8 = vector.multi_reduction <add>, %7, %cst_2 [1] : vector<16x32xf32> to vector<16xf32>
    %9 = vector.shape_cast %8 : vector<16xf32> to vector<16x1xf32>
    %cst_3 = arith.constant 0.0322580636 : f32
    %10 = vector.broadcast %cst_3 : f32 to vector<16x1xf32>
    %11 = arith.mulf %9, %10 : vector<16x1xf32>
    %12 = math.sqrt %11 : vector<16x1xf32>
    %cst_4 = arith.constant 9.99999997E-7 : f32
    %13 = vector.broadcast %cst_4 : f32 to vector<16x1xf32>
    %14 = arith.addf %12, %13 : vector<16x1xf32>
    %15 = tpu.reciprocal %14 : vector<16x1xf32> -> vector<16x1xf32>
    %c0_5 = arith.constant 0 : index
    %c0_6 = arith.constant 0 : index
    %16 = vector.load %arg2[%c0_5, %c0_6] : memref<1x32xf32, #tpu.memory_space<vmem>>, vector<1x32xf32>
    %17 = vector.broadcast %15 : vector<16x1xf32> to vector<16x32xf32>
    %18 = arith.mulf %6, %17 : vector<16x32xf32>
    %19 = vector.broadcast %16 : vector<1x32xf32> to vector<16x32xf32>
    %20 = arith.mulf %19, %18 : vector<16x32xf32>
    %c0_7 = arith.constant 0 : index
    %c0_8 = arith.constant 0 : index
    %21 = vector.load %arg3[%c0_7, %c0_8] : memref<1x32xf32, #tpu.memory_space<vmem>>, vector<1x32xf32>
    %22 = vector.broadcast %21 : vector<1x32xf32> to vector<16x32xf32>
    %23 = arith.addf %20, %22 : vector<16x32xf32>
    %c0_9 = arith.constant 0 : index
    %c0_10 = arith.constant 0 : index
    %24 = vector.load %arg4[%c0_9, %c0_10] : memref<16x32xf32, #tpu.memory_space<vmem>>, vector<16x32xf32>
    tpu.vector_store %arg4[%c0_9, %c0_10], %23 {strides = array<i32>} : memref<16x32xf32, #tpu.memory_space<vmem>>, vector<16x32xf32>,
    return
  }
  func.func @transform_0(%arg0: i32) -> (i32, i32) {
    %c0_i32 = arith.constant 0 : i32
    %c0_i32_0 = arith.constant 0 : i32
    return %arg0, %c0_i32 : i32, i32
  }
  func.func @transform_1(%arg0: i32) -> (i32, i32) {
    %c0_i32 = arith.constant 0 : i32
    %c0_i32_0 = arith.constant 0 : i32
    %c0_i32_1 = arith.constant 0 : i32
    return %c0_i32, %c0_i32_0 : i32, i32
  }
  func.func @transform_2(%arg0: i32) -> (i32, i32) {
    %c0_i32 = arith.constant 0 : i32
    %c0_i32_0 = arith.constant 0 : i32
    %c0_i32_1 = arith.constant 0 : i32
    return %c0_i32, %c0_i32_0 : i32, i32
  }
  func.func @transform_3(%arg0: i32) -> (i32, i32) {
    %c0_i32 = arith.constant 0 : i32
    %c0_i32_0 = arith.constant 0 : i32
    return %arg0, %c0_i32 : i32, i32
  }
}

</mosaic_0001>

<bundles_post_ra>
// kernel: tpu_custom_call.1
= control target key start
LH: loop header
LB: loop body
LE: loop exit
PB: predicated region body
PF: predicated region fallthrough
CT: control target
= control target key end

     0   :  { %8 = vsyncpa [#allocation3], 0  ;;  %s316_s0 = inlined_call_operand.hbm [shape: f32[16,32], index: 0, kind: input, shape index: {}]   ;;  %s317_s1 = inlined_call_operand.hbm [shape: f32[1,32], index: 1, kind: input, shape index: {}]   ;;  %s318_s2 = inlined_call_operand.vmem [shape: f32[1,32], index: 2, kind: input, shape index: {}]   ;;  %s319_s3 = inlined_call_operand.hbm [shape: f32[16,32], index: 3, kind: output, shape index: {}]  }
   0x1   :  { %9 = vsyncpa [#allocation6], 0 }
   0x2   :  { %10 = vsyncpa [#allocation4], 0  ;;  %s15_s14 = sshll.u32 %s316_s0, 4  ;;  %s261_s15 = smov [#allocation2]   ;;  %s16_s14 = int_to_ptr.hbm [resolvable:$true] %s15_s14 }
   0x3   :  { %s17_s16 = sshll.u32 %s261_s15, 4  ;;  %s29_s19 = sshll.u32 %s317_s1, 4  ;;  %s18_s16 = int_to_ptr.vmem [resolvable:$true] %s17_s16  ;;  %s30_s19 = int_to_ptr.hbm [resolvable:$true] %s29_s19 }
   0x4   :  { %s262_s20 = smov 128   ;;  %s263_s21 = smov 8  }
   0x5   :  { %23 = dma.hbm_to_vmem [thread:$0]  %s16_s14, 256, %s18_s16, [#allocation3], %s262_s20, %s262_s20, %s263_s21  }
   0x6   :  { %s264_s22 = smov [#allocation5]  }
   0x7   :  { %s31_s23 = sshll.u32 %s264_s22, 4  ;;  %s32_s23 = int_to_ptr.vmem [resolvable:$true] %s31_s23 }
   0x8   :  { %34 = dma.hbm_to_vmem [thread:$0]  %s30_s19, 16, %s32_s23, [#allocation6]  }
   0x9   :  { %255 = dma.done.wait [#allocation3], 256  }
   0xa   :  { %256 = vsyncadd [#allocation3], 4294967040 }
   0xb   :  { %257 = dma.done.wait [#allocation6], 16  }
   0xc   :  { %258 = vsyncadd [#allocation6], 4294967280  ;;  %vm47_vm0 = vcmask 261120   ;;  %v45_v0 = vld [vmem:[#allocation2] sm:$0xff]  ;;  %v46_v2 = vld [vmem:[#allocation2 + $0x8] sm:$0xff]  ;;  %v265_v4 = vmov 32.0  }
   0xd   :  { %v48_v1 = vsel %vm47_vm0, %v45_v0, 0.0  ;;  %v51_v3 = vsel %vm47_vm0, %v46_v2, 0.0  ;;  %173 = vrcp.f32 %v265_v4  ;;  %v171_v58 = vld [vmem:[#allocation5] ss:$0 sm:$0xff]  ;;  %v172_v62 = vld [vmem:[%s318_s2] ss:$0 sm:$0xff] }
   0xe   :  { %49 = vadd.xlane.f32.xlu0 %v48_v1  ;;  %s266_s24 = smov [#allocation7]   ;;  %s151_s27 = sshll.u32 %s319_s3, 4  ;;  %s152_s27 = int_to_ptr.hbm [resolvable:$true] %s151_s27 }
   0xf   :  { %s149_s25 = sshll.u32 %s266_s24, 4  ;;  %s150_s25 = int_to_ptr.vmem [resolvable:$true] %s149_s25 }
  0x13   :  { %v174_v5 = vpop.eup %173 }
  0x14   :  { %v55_v6 = vmul.f32 32.0, %v174_v5  ;;  %vm59_vm1 = vweird.f32 %v174_v5 }
  0x16   :  { %52 = vadd.xlane.f32.xlu0 %v51_v3  ;;  %v56_v7 = vsub.f32 1.0, %v55_v6 }
  0x18   :  { %v57_v8 = vmul.f32 %v174_v5, %v56_v7 }
  0x1a   :  { %v58_v9 = vadd.f32 %v174_v5, %v57_v8 }
  0x1c   :  { %v60_v10 = vsel %vm59_vm1, %v174_v5, %v58_v9 }
  0x81   :  { %v50_v11 = vpop.xlane.xlu0 %49 }
  0x82   :  { %v61_v12 = vmul.f32 %v60_v10, %v50_v11 }
  0x84   :  { %v63_v13 = vsub.f32 %v45_v0, %v61_v12 }
  0x86   :  { %v65_v14 = vmul.f32 %v63_v13, %v63_v13 }
  0x88   :  { %v67_v15 = vsel %vm47_vm0, %v65_v14, 0.0 }
  0x89   :  { %68 = vadd.xlane.f32.xlu1 %v67_v15  ;;  %v53_v16 = vpop.xlane.xlu0 %52 }
  0x8a   :  { %v62_v17 = vmul.f32 %v60_v10, %v53_v16 }
  0x8c   :  { %v299_v18 = vsub.f32 %v46_v2, %v62_v17 }
  0x8e   :  { %v66_v19 = vmul.f32 %v299_v18, %v299_v18 }
  0x90   :  { %v70_v20 = vsel %vm47_vm0, %v66_v19, 0.0 }
  0x91   :  { %71 = vadd.xlane.f32.xlu1 %v70_v20 }
  0xfc   :  { %v69_v21 = vpop.xlane.xlu1 %68 }
  0xfd   :  { %v73_v22 = vmul.f32 0.032258064, %v69_v21 }
  0xff   :  { %175 = vrsqrt.f32 %v73_v22  ;;  %vm82_vm2 = vcmp.eq.f32.partialorder %v73_v22, inf  ;;  %v85_v35 = vand.u32 2147483648, %v73_v22  ;;  %vm84_vm3 = vcmp.eq.f32.partialorder %v73_v22, 0.0 }
 0x104   :  { %v72_v23 = vpop.xlane.xlu1 %71 }
 0x105   :  { %v176_v24 = vpop.eup %175  ;;  %v74_v25 = vmul.f32 0.032258064, %v72_v23 }
 0x106   :  { %v76_v26 = vmul.f32 %v176_v24, %v73_v22 }
 0x107   :  { %177 = vrsqrt.f32 %v74_v25  ;;  %vm94_vm4 = vcmp.eq.f32.partialorder %v74_v25, inf  ;;  %v97_v43 = vand.u32 2147483648, %v74_v25  ;;  %vm96_vm5 = vcmp.eq.f32.partialorder %v74_v25, 0.0 }
 0x108   :  { %v77_v27 = vmul.f32 %v176_v24, %v76_v26 }
 0x10a   :  { %v78_v28 = vmul.f32 0.5, %v77_v27 }
 0x10c   :  { %v79_v29 = vsub.f32 1.5, %v78_v28 }
 0x10d   :  { %v178_v30 = vpop.eup %177 }
 0x10e   :  { %v80_v31 = vmul.f32 %v176_v24, %v79_v29  ;;  %v88_v32 = vmul.f32 %v178_v30, %v74_v25 }
 0x110   :  { %v81_v33 = vmul.f32 %v80_v31, %v73_v22  ;;  %v89_v34 = vmul.f32 %v178_v30, %v88_v32 }
 0x112   :  { %v83_v36 = vsel %vm82_vm2, %v73_v22, %v81_v33  ;;  %v90_v37 = vmul.f32 0.5, %v89_v34 }
 0x113   :  { %v86_v38 = vsel %vm84_vm3, %v85_v35, %v83_v36 }
 0x114   :  { %v99_v39 = vadd.f32 1e-06, %v86_v38  ;;  %v91_v40 = vsub.f32 1.5, %v90_v37 }
 0x116   :  { %179 = vrcp.f32 %v99_v39  ;;  %v92_v41 = vmul.f32 %v178_v30, %v91_v40  ;;  %v112_v50 = vand.u32 2147483648, %v99_v39  ;;  %v110_v52 = vand.u32 2147483647, %v99_v39 }
 0x117   :  { %vm106_vm7 = vweird.f32 %v99_v39 }
 0x118   :  { %v93_v42 = vmul.f32 %v92_v41, %v74_v25  ;;  %v113_v55 = vor.u32 1.1754944e-38, %v112_v50  ;;  %vm111_vm9 = vcmp.eq.f32.partialorder %v110_v52, 8.507059e+37 }
 0x11a   :  { %v95_v44 = vsel %vm94_vm4, %v74_v25, %v93_v42 }
 0x11b   :  { %v98_v45 = vsel %vm96_vm5, %v97_v43, %v95_v44 }
 0x11c   :  { %v180_v46 = vpop.eup %179  ;;  %v100_v47 = vadd.f32 1e-06, %v98_v45 }
 0x11d   :  { %v102_v48 = vmul.f32 %v180_v46, %v99_v39  ;;  %vm107_vm6 = vweird.f32 %v180_v46 }
 0x11e   :  { %181 = vrcp.f32 %v100_v47  ;;  %vm108_vm8 = vmor %vm106_vm7, %vm107_vm6  ;;  %v126_v63 = vand.u32 2147483648, %v100_v47  ;;  %v124_v1 = vand.u32 2147483647, %v100_v47  ;;  %vm120_vm11 = vweird.f32 %v100_v47 }
 0x11f   :  { %v103_v49 = vsub.f32 1.0, %v102_v48 }
 0x120   :  { %v127_v5 = vor.u32 1.1754944e-38, %v126_v63  ;;  %vm125_vm13 = vcmp.eq.f32.partialorder %v124_v1, 8.507059e+37 }
 0x121   :  { %v104_v51 = vmul.f32 %v180_v46, %v103_v49 }
 0x123   :  { %v105_v53 = vadd.f32 %v180_v46, %v104_v51 }
 0x124   :  { %v182_v54 = vpop.eup %181 }
 0x125   :  { %v109_v56 = vsel %vm108_vm8, %v180_v46, %v105_v53  ;;  %v116_v57 = vmul.f32 %v182_v54, %v100_v47  ;;  %vm121_vm10 = vweird.f32 %v182_v54 }
 0x126   :  { %v114_v59 = vsel %vm111_vm9, %v113_v55, %v109_v56  ;;  %vm122_vm12 = vmor %vm120_vm11, %vm121_vm10 }
 0x127   :  { %v117_v60 = vsub.f32 1.0, %v116_v57  ;;  %v130_v61 = vmul.f32 %v114_v59, %v63_v13 }
 0x129   :  { %v118_v0 = vmul.f32 %v182_v54, %v117_v60  ;;  %v135_v2 = vmul.f32 %v171_v58, %v130_v61 }
 0x12b   :  { %v119_v3 = vadd.f32 %v182_v54, %v118_v0  ;;  %v141_v4 = vadd.f32 %v172_v62, %v135_v2 }
 0x12d   :  { %v123_v6 = vsel %vm122_vm12, %v182_v54, %v119_v3  ;;  %143 = vst.msk [vmem:[#allocation7] sm:$0xff] %vm47_vm0, %v141_v4 }
 0x12e   :  { %v128_v7 = vsel %vm125_vm13, %v127_v5, %v123_v6 }
 0x12f   :  { %v131_v8 = vmul.f32 %v128_v7, %v299_v18 }
 0x131   :  { %v136_v9 = vmul.f32 %v171_v58, %v131_v8 }
 0x133   :  { %v142_v10 = vadd.f32 %v172_v62, %v136_v9 }
 0x135   :  { %144 = vst.msk [vmem:[#allocation7 + $0x8] sm:$0xff] %vm47_vm0, %v142_v10 }
 0x136   :  { %157 = dma.vmem_to_hbm [thread:$0]  %s150_s25, 256, %s152_s27, [#allocation4], %s262_s20, %s262_s20, %s263_s21  }
 0x137   :  { %259 = dma.done.wait [#allocation4], 256  }
 0x138   :  { %260 = vsyncadd [#allocation4], 4294967040 }
 0x139   :  { %162 = vsyncpa [#allocation3], 1 }
 0x13a   :  { %163 = vsyncpa [#allocation6], 1 }
 0x13b   :  { %164 = vsyncpa [#allocation4], 1 }

</bundles_post_ra>
